<compile_context>
chip_gen: v5e
topology: v5e:2x2
jax: 0.10.0
libtpu: 0.0.40
codegen_flags: <defaults>
</compile_context>

<pallas_src>
import jax
import jax.numpy as jnp
import numpy as np
from jax import lax
from jax.experimental import pallas as pl
from jax.experimental.pallas import tpu as pltpu


def get_padding(kernel_size, dilation=1):
    return int((kernel_size * dilation - dilation) / 2)


def _leaky(x, slope):
    return jnp.where(x >= 0, x, slope * x)


def _round_up(x, m):
    return ((x + m - 1) // m) * m


def _cdiv(a, b):
    return (a + b - 1) // b


def _auto_vmem(est_bytes, user_bytes):
    """Explicit VMEM limit when the blocks outgrow the compiler's scoped
    default (16 MiB on v5e / 32 MiB on v6e & v7x); None otherwise."""
    if user_bytes is not None:
        return user_bytes
    if est_bytes <= (12 << 20):
        return None
    # NOTE: on v7x (64 MiB physical VMEM) keep tile_t small enough that this
    # stays below ~48 MiB.
    return min(int(est_bytes * 1.5) + (4 << 20), 110 << 20)


# ----------------------------------------------------------------------------
# Tile selection: output tile along T plus a halo block (multiple of 8 rows,
# dividing the tile) that covers the extra rows each tile needs.
# ----------------------------------------------------------------------------
def _pick_tiles(t_out, halo, tile_t):
    tile = min(_round_up(max(tile_t, 8), 8), _round_up(t_out, 8))
    tile = max(tile, _round_up(max(halo, 1), 8))
    n_t = _cdiv(t_out, tile)
    halo_blk = tile
    for cand in range(8, tile + 1, 8):
        if tile % cand == 0 and cand >= halo:
            halo_blk = cand
            break
    return tile, n_t, halo_blk


# ----------------------------------------------------------------------------
# Plain conv1d kernel (dilated, stride 1).  Optional fused pre-activation
# (LeakyReLU on the input).  Used for the pre-conv and the polyphase tconv.
# ----------------------------------------------------------------------------
def _make_conv_kernel(K, dilation, tile, pre_slope, fuse_taps):
    def kernel(x_main, x_halo, w_ref, b_ref, o_ref):
        x = jnp.concatenate([x_main[0], x_halo[0]], axis=0)   # (tile+halo, Cin)
        if pre_slope is not None:
            x = _leaky(x, pre_slope)                           # leaky(0) == 0
        c_out = o_ref.shape[2]
        if fuse_taps:
            # one wide contraction (K*C_in) to fill the MXU for small channels
            if K > 1:
                xc = jnp.concatenate(
                    [x[k * dilation:k * dilation + tile, :] for k in range(K)],
                    axis=1)
            else:
                xc = x[:tile, :]
            acc = jnp.dot(xc, w_ref[...], preferred_element_type=jnp.float32)
        else:
            acc = jnp.zeros((tile, c_out), jnp.float32)
            for k in range(K):
                acc = acc + jnp.dot(x[k * dilation:k * dilation + tile, :],
                                    w_ref[k], preferred_element_type=jnp.float32)
        acc = acc + b_ref[...]                                 # (1, C_out) f32
        o_ref[0] = acc.astype(o_ref.dtype)
    return kernel


def conv1d_pallas(x_btc, w_kio, bias_1o, *, dilation=1, pad_left=0, pad_right=0,
                  pre_slope=None, tile_t=1024, fuse_taps=None,
                  vmem_limit_bytes=None):
    """x_btc: (B, T, C_in); w_kio: (K, C_in, C_out); bias_1o: (1, C_out) f32."""
    B, T, c_in = x_btc.shape
    K, _, c_out = w_kio.shape
    halo = dilation * (K - 1)
    t_out = T + pad_left + pad_right - halo
    assert t_out >= 1
    if fuse_taps is None:
        fuse_taps = (c_in <= 32) and (K * c_in <= 2048)

    tile, n_t, halo_blk = _pick_tiles(t_out, halo, tile_t)
    ratio = tile // halo_blk
    t_in_pad = n_t * tile + halo_blk
    extra = t_in_pad - (T + pad_left + pad_right)
    x_pad = jnp.pad(x_btc, ((0, 0), (pad_left, pad_right + extra), (0, 0)))
    t_out_pad = n_t * tile

    w_oper = w_kio.reshape(K * c_in, c_out) if fuse_taps else w_kio
    w_spec = (pl.BlockSpec((K * c_in, c_out), lambda b, t: (0, 0)) if fuse_taps
              else pl.BlockSpec((K, c_in, c_out), lambda b, t: (0, 0, 0)))

    isz = jnp.dtype(x_btc.dtype).itemsize
    est = (2 * (tile + halo_blk) * c_in + 2 * tile * c_out) * isz \
        + 2 * K * c_in * c_out * isz + 8 * c_out + (1 << 20)
    vlim = _auto_vmem(est, vmem_limit_bytes)

    kernel = _make_conv_kernel(K, dilation, tile, pre_slope, fuse_taps)
    out = pl.pallas_call(
        kernel,
        out_shape=jax.ShapeDtypeStruct((B, t_out_pad, c_out), x_btc.dtype),
        grid=(B, n_t),
        in_specs=[
            pl.BlockSpec((1, tile, c_in), lambda b, t: (b, t, 0)),
            pl.BlockSpec((1, halo_blk, c_in), lambda b, t: (b, (t + 1) * ratio, 0)),
            w_spec,
            pl.BlockSpec((1, c_out), lambda b, t: (0, 0)),
        ],
        out_specs=pl.BlockSpec((1, tile, c_out), lambda b, t: (b, t, 0)),
        compiler_params=pltpu.CompilerParams(
            dimension_semantics=("parallel", "parallel"),
            vmem_limit_bytes=vlim),
    )(x_pad, x_pad, w_oper, bias_1o)
    return out if t_out_pad == t_out else out[:, :t_out, :]


# ----------------------------------------------------------------------------
# Fused ResBlock layer:  out = x + leaky(conv2(leaky(conv1(x))))  [+ accum]
# in a single pallas_call.  conv1 is dilated, conv2 has dilation 1, both use
# 'same' padding; the intermediate h stays in a VMEM scratch.
# ----------------------------------------------------------------------------
def _make_resblock_kernel(K, dilation, tile, t_valid, has_acc, fuse_taps):
    p1 = get_padding(K, dilation)
    p2 = get_padding(K, 1)
    halo2 = K - 1
    h_rows = tile + halo2
    off_res = p1 + p2

    def compute(x_main, x_halo, w1_ref, b1_ref, w2_ref, b2_ref, acc_ref,
                o_ref, h_ref):
        x = jnp.concatenate([x_main[0], x_halo[0]], axis=0)   # (tile+halo_blk, C)
        c_mid = b1_ref.shape[1]
        c_out = b2_ref.shape[1]

        # conv1 (dilated) over h_rows output rows.
        if fuse_taps:
            if K > 1:
                xc = jnp.concatenate(
                    [x[k * dilation:k * dilation + h_rows, :] for k in range(K)],
                    axis=1)
            else:
                xc = x[:h_rows, :]
            h = jnp.dot(xc, w1_ref[...], preferred_element_type=jnp.float32)
        else:
            h = jnp.zeros((h_rows, c_mid), jnp.float32)
            for k in range(K):
                h = h + jnp.dot(x[k * dilation:k * dilation + h_rows, :],
                                w1_ref[k], preferred_element_type=jnp.float32)
        h = _leaky(h + b1_ref[...], 0.1)

        # conv2's zero-padding semantics: zero h rows whose global position
        # lies outside the valid sequence [0, t_valid).
        pos = (pl.program_id(1) * tile - p2
               + lax.broadcasted_iota(jnp.int32, (h_rows, 1), 0))
        h = jnp.where((pos >= 0) & (pos < t_valid), h, 0.0)
        h_ref[0:h_rows, :] = h.astype(h_ref.dtype)

        # conv2 (dilation 1) over tile output rows.
        if fuse_taps:
            if K > 1:
                hc = jnp.concatenate(
                    [h_ref[k:k + tile, :] for k in range(K)], axis=1)
            else:
                hc = h_ref[0:tile, :]
            y = jnp.dot(hc, w2_ref[...], preferred_element_type=jnp.float32)
        else:
            y = jnp.zeros((tile, c_out), jnp.float32)
            for k in range(K):
                y = y + jnp.dot(h_ref[k:k + tile, :], w2_ref[k],
                                preferred_element_type=jnp.float32)
        y = _leaky(y + b2_ref[...], 0.1)

        out = y + x[off_res:off_res + tile, :].astype(jnp.float32)  # residual
        if acc_ref is not None:
            out = out + acc_ref[0].astype(jnp.float32)               # MRF accum
        o_ref[0] = out.astype(o_ref.dtype)

    if has_acc:
        def kernel(x_main, x_halo, w1, b1, w2, b2, acc, o_ref, h_ref):
            compute(x_main, x_halo, w1, b1, w2, b2, acc, o_ref, h_ref)
    else:
        def kernel(x_main, x_halo, w1, b1, w2, b2, o_ref, h_ref):
            compute(x_main, x_halo, w1, b1, w2, b2, None, o_ref, h_ref)
    return kernel


def resblock_layer_pallas(x_btc, w1, b1, w2, b2, *, kernel_size, dilation,
                          accum=None, tile_t=1024, fuse_taps=None,
                          vmem_limit_bytes=None):
    """One HiFi-GAN ResBlock layer, fused.  w1/w2: (K, C, C); b1/b2: (1, C)."""
    B, T, C = x_btc.shape
    K = kernel_size
    assert K % 2 == 1, "MRF kernel sizes must be odd for 'same' residual convs"
    p1 = get_padding(K, dilation)
    p2 = get_padding(K, 1)
    halo = 2 * (p1 + p2)
    t_out = T
    if fuse_taps is None:
        fuse_taps = (C <= 32) and (K * C <= 2048)

    tile, n_t, halo_blk = _pick_tiles(t_out, halo, tile_t)
    ratio = tile // halo_blk
    t_in_pad = n_t * tile + halo_blk
    extra = t_in_pad - (T + 2 * (p1 + p2))
    x_pad = jnp.pad(x_btc, ((0, 0), (p1 + p2, p1 + p2 + extra), (0, 0)))
    t_out_pad = n_t * tile

    if fuse_taps:
        w1_op, w2_op = w1.reshape(K * C, C), w2.reshape(K * C, C)
        w1_spec = pl.BlockSpec((K * C, C), lambda b, t: (0, 0))
        w2_spec = pl.BlockSpec((K * C, C), lambda b, t: (0, 0))
    else:
        w1_op, w2_op = w1, w2
        w1_spec = pl.BlockSpec((K, C, C), lambda b, t: (0, 0, 0))
        w2_spec = pl.BlockSpec((K, C, C), lambda b, t: (0, 0, 0))

    operands = [x_pad, x_pad, w1_op, b1, w2_op, b2]
    in_specs = [
        pl.BlockSpec((1, tile, C), lambda b, t: (b, t, 0)),
        pl.BlockSpec((1, halo_blk, C), lambda b, t: (b, (t + 1) * ratio, 0)),
        w1_spec, pl.BlockSpec((1, C), lambda b, t: (0, 0)),
        w2_spec, pl.BlockSpec((1, C), lambda b, t: (0, 0)),
    ]
    if accum is not None:
        acc = accum if accum.shape[1] == t_out_pad else jnp.pad(
            accum, ((0, 0), (0, t_out_pad - accum.shape[1]), (0, 0)))
        operands.append(acc)
        in_specs.append(pl.BlockSpec((1, tile, C), lambda b, t: (b, t, 0)))

    h_rows_pad = _round_up(tile + (K - 1), 8)
    isz = jnp.dtype(x_btc.dtype).itemsize
    est = (2 * (tile + halo_blk) * C + 2 * tile * C) * isz \
        + 4 * K * C * C * isz + h_rows_pad * C * isz \
        + (2 * tile * C * isz if accum is not None else 0) + (2 << 20)
    vlim = _auto_vmem(est, vmem_limit_bytes)

    kernel = _make_resblock_kernel(K, dilation, tile, T, accum is not None,
                                   fuse_taps)
    out = pl.pallas_call(
        kernel,
        out_shape=jax.ShapeDtypeStruct((B, t_out_pad, C), x_btc.dtype),
        grid=(B, n_t),
        in_specs=in_specs,
        out_specs=pl.BlockSpec((1, tile, C), lambda b, t: (b, t, 0)),
        scratch_shapes=[pltpu.VMEM((h_rows_pad, C), x_btc.dtype)],
        compiler_params=pltpu.CompilerParams(
            dimension_semantics=("parallel", "parallel"),
            vmem_limit_bytes=vlim),
    )(*operands)
    return out if t_out_pad == t_out else out[:, :t_out, :]


# ----------------------------------------------------------------------------
# Final Conv1d(C_in -> 1) + LeakyReLU(0.01) pre-act + tanh, with a lane-dense
# output layout (time on the 128-wide lane axis) and a VPU reduction instead
# of an N=1 MXU matmul.
# ----------------------------------------------------------------------------
def _make_post_kernel(K, tile, pre_slope):
    def kernel(x_main, x_halo, w_ref, b_ref, o_ref):
        x = jnp.concatenate([x_main[0], x_halo[0]], axis=0).astype(jnp.float32)
        if pre_slope is not None:
            x = _leaky(x, pre_slope)
        c_in = x.shape[1]
        acc = jnp.zeros((tile, c_in), jnp.float32)
        for k in range(K):
            acc = acc + x[k:k + tile, :] * w_ref[k].astype(jnp.float32)
        out = jnp.sum(acc, axis=1) + b_ref[0]
        out = jnp.tanh(out)
        o_ref[0, 0, :] = out.astype(o_ref.dtype)
    return kernel


def conv1d_cout1_pallas(x_btc, w_k1i, bias1, *, pad_left, pad_right,
                        pre_slope=None, tile_t=1024, vmem_limit_bytes=None):
    """w_k1i: (K, 1, C_in); bias1: (1,) f32 (passed through SMEM)."""
    B, T, c_in = x_btc.shape
    K = w_k1i.shape[0]
    halo = K - 1
    t_out = T + pad_left + pad_right - halo
    if t_out <= tile_t:
        tile = _round_up(t_out, 8)
        n_t = 1
    else:
        tile = _round_up(tile_t, 128)       # lane-dense output blocks
        n_t = _cdiv(t_out, tile)
    tile = max(tile, _round_up(max(halo, 1), 8))
    halo_blk = tile
    for cand in range(8, tile + 1, 8):
        if tile % cand == 0 and cand >= halo:
            halo_blk = cand
            break
    ratio = tile // halo_blk
    t_in_pad = n_t * tile + halo_blk
    extra = t_in_pad - (T + pad_left + pad_right)
    x_pad = jnp.pad(x_btc, ((0, 0), (pad_left, pad_right + extra), (0, 0)))
    t_out_pad = n_t * tile

    out = pl.pallas_call(
        _make_post_kernel(K, tile, pre_slope),
        out_shape=jax.ShapeDtypeStruct((B, 1, t_out_pad), jnp.float32),
        grid=(B, n_t),
        in_specs=[
            pl.BlockSpec((1, tile, c_in), lambda b, t: (b, t, 0)),
            pl.BlockSpec((1, halo_blk, c_in), lambda b, t: (b, (t + 1) * ratio, 0)),
            pl.BlockSpec((K, 1, c_in), lambda b, t: (0, 0, 0)),
            pl.BlockSpec(memory_space=pltpu.MemorySpace.SMEM),
        ],
        out_specs=pl.BlockSpec((1, 1, tile), lambda b, t: (b, 0, t)),
        compiler_params=pltpu.CompilerParams(
            dimension_semantics=("parallel", "parallel"),
            vmem_limit_bytes=vmem_limit_bytes),
    )(x_pad, x_pad, w_k1i, bias1)
    return out if t_out_pad == t_out else out[:, :, :t_out]


# ----------------------------------------------------------------------------
# Polyphase plan for ConvTranspose1d(stride=r, padding=p, kernel=K).  Works for
# any (K, r, p): phases with fewer taps get zero taps and the tail is trimmed.
# ----------------------------------------------------------------------------
def _tconv_plan(K, r, p):
    per_phase = []
    offs = []
    for q in range(r):
        k0 = (q + p) % r
        d = (q + p) // r
        ks_ = list(range(k0, K, r))
        per_phase.append((d, ks_))
        offs += [d - j for j in range(len(ks_))]
    if not offs:
        offs = [0]
    o_min, o_max = min(offs), max(offs)
    L = o_max - o_min + 1
    pad_left = -o_min
    m_per = -((-(K - 2 * p)) // r)                 # ceil((K - 2p) / r)
    pad_right = m_per - 1 + o_max
    trim = m_per * r - (K - 2 * p)                 # extra outputs to drop
    assert pad_left >= 0 and pad_right >= 0 and trim >= 0
    return dict(per_phase=per_phase, o_min=o_min, L=L,
                pad_left=pad_left, pad_right=pad_right, trim=trim)


def _build_polyphase_weight(w_iok, r, p):
    c_in, c_out, K = w_iok.shape
    plan = _tconv_plan(K, r, p)
    wp = jnp.zeros((plan['L'], c_in, r * c_out), w_iok.dtype)
    for q, (d, ks_) in enumerate(plan['per_phase']):
        for j, k in enumerate(ks_):
            l = (d - j) - plan['o_min']
            wp = wp.at[l, :, q * c_out:(q + 1) * c_out].set(w_iok[:, :, k])
    return wp


# ----------------------------------------------------------------------------
# Parameter preparation: weight transposes, polyphase construction, 1/n_mrf
# scale folding and dtype cast -- done once at load time.
# ----------------------------------------------------------------------------
def prepare_params(raw, cfg, compute_dtype=jnp.float32):
    dt = compute_dtype
    f32 = jnp.float32
    n_mrf = len(cfg['mrf_kernel_sizes'])
    mrf_scale = 1.0 / n_mrf
    prep = {'pre_w': jnp.transpose(raw['pre_w'], (2, 1, 0)).astype(dt),
            'pre_b': raw['pre_b'].reshape(1, -1).astype(f32),
            'blocks': []}
    for i, blk in enumerate(raw['blocks']):
        r = cfg['upsample_rates'][i]
        ks = cfg['upsample_kernel_sizes'][i]
        p = (ks - r) // 2
        plan = _tconv_plan(ks, r, p)
        # Fold the previous stage's 1/n_mrf MRF scale into this tconv weight
        # (leaky is positively homogeneous, so the fold is exact).
        scale = mrf_scale if i > 0 else 1.0
        tw = _build_polyphase_weight(blk['tconv_w'] * scale, r, p).astype(dt)
        tb = jnp.tile(blk['tconv_b'], r).reshape(1, -1).astype(f32)
        pb = {'tconv_w': tw, 'tconv_b': tb, 'r': r,
              'pad_left': plan['pad_left'], 'pad_right': plan['pad_right'],
              'trim': plan['trim'], 'mrf': []}
        for j, ksz in enumerate(cfg['mrf_kernel_sizes']):
            layers = []
            for li, d in enumerate(cfg['mrf_dilations'][j]):
                pr = blk['mrf'][j][li]
                layers.append({
                    'w1': jnp.transpose(pr['w1'], (2, 1, 0)).astype(dt),
                    'b1': pr['b1'].reshape(1, -1).astype(f32),
                    'w2': jnp.transpose(pr['w2'], (2, 1, 0)).astype(dt),
                    'b2': pr['b2'].reshape(1, -1).astype(f32)})
            pb['mrf'].append(layers)
        prep['blocks'].append(pb)
    # Fold the last stage's 1/n_mrf scale into the post conv weight.
    prep['post_w'] = jnp.transpose(raw['post_w'] * mrf_scale, (2, 0, 1)).astype(dt)
    prep['post_b'] = raw['post_b'].astype(f32)                          # (1,)
    return prep


# ----------------------------------------------------------------------------
# Generator forward (Pallas)
# ----------------------------------------------------------------------------
def generator_forward(params, x_ncl, cfg, *, tile_t=1024, vmem_limit_bytes=None):
    dt = params['pre_w'].dtype
    kw = dict(tile_t=tile_t, vmem_limit_bytes=vmem_limit_bytes)
    x = jnp.transpose(x_ncl, (0, 2, 1)).astype(dt)            # (B, T, 80)
    x = conv1d_pallas(x, params['pre_w'], params['pre_b'],
                      pad_left=3, pad_right=3, **kw)

    for blk in params['blocks']:
        r = blk['r']
        # Polyphase transposed conv; LeakyReLU(0.1) fused as pre-activation.
        y = conv1d_pallas(x, blk['tconv_w'], blk['tconv_b'],
                          pad_left=blk['pad_left'], pad_right=blk['pad_right'],
                          pre_slope=0.1, **kw)
        B_, M, rc = y.shape
        x = y.reshape(B_, M * r, rc // r)                     # free interleave
        if blk['trim']:
            x = x[:, :M * r - blk['trim'], :]

        # MRF: each ResBlock layer is one fused kernel; the branch sum is
        # fused into the last layer of each branch (1/n_mrf folded into the
        # next layer's weights).
        y_sum = None
        for j, ksz in enumerate(cfg['mrf_kernel_sizes']):
            rb = x
            dils = cfg['mrf_dilations'][j]
            for li, d in enumerate(dils):
                pr = blk['mrf'][j][li]
                acc = y_sum if (li == len(dils) - 1) else None
                rb = resblock_layer_pallas(rb, pr['w1'], pr['b1'],
                                           pr['w2'], pr['b2'],
                                           kernel_size=ksz, dilation=d,
                                           accum=acc, **kw)
            y_sum = rb
        x = y_sum

    # final LeakyReLU(0.01) + Conv1d(c, 1, 7, padding=3) + tanh (lane-dense).
    return conv1d_cout1_pallas(x, params['post_w'], params['post_b'],
                               pad_left=3, pad_right=3, pre_slope=0.01, **kw)


# ----------------------------------------------------------------------------
# Pure-JAX reference (lax.conv_general_dilated) for numeric verification.
# ----------------------------------------------------------------------------
def _ref_conv1d(x_nct, w, b, dilation=1, padding=0):
    out = lax.conv_general_dilated(
        x_nct, w, window_strides=(1,), padding=[(padding, padding)],
        rhs_dilation=(dilation,), dimension_numbers=('NCH', 'OIH', 'NCH'))
    return out + b[None, :, None]


def _ref_conv_transpose1d(x_nct, w_iok, b, stride, padding):
    K = w_iok.shape[2]
    w_conv = jnp.transpose(w_iok[:, :, ::-1], (1, 0, 2))
    out = lax.conv_general_dilated(
        x_nct, w_conv, window_strides=(1,),
        padding=[(K - 1 - padding, K - 1 - padding)],
        lhs_dilation=(stride,), dimension_numbers=('NCH', 'OIH', 'NCH'))
    return out + b[None, :, None]


def ref_forward(params, x_ncl, cfg):
    x = _ref_conv1d(x_ncl, params['pre_w'], params['pre_b'], padding=3)
    for i, blk in enumerate(params['blocks']):
        r = cfg['upsample_rates'][i]
        ks = cfg['upsample_kernel_sizes'][i]
        x = _leaky(x, 0.1)
        x = _ref_conv_transpose1d(x, blk['tconv_w'], blk['tconv_b'],
                                  stride=r, padding=(ks - r) // 2)
        y = None
        for j, ksz in enumerate(cfg['mrf_kernel_sizes']):
            rb = x
            for li, d in enumerate(cfg['mrf_dilations'][j]):
                p = blk['mrf'][j][li]
                h = _leaky(_ref_conv1d(rb, p['w1'], p['b1'], dilation=d,
                                       padding=get_padding(ksz, d)), 0.1)
                h = _leaky(_ref_conv1d(h, p['w2'], p['b2'], dilation=1,
                                       padding=get_padding(ksz, 1)), 0.1)
                rb = rb + h
            y = rb if y is None else y + rb
        x = y / float(len(cfg['mrf_kernel_sizes']))
    x = _leaky(x, 0.01)
    x = _ref_conv1d(x, params['post_w'], params['post_b'], padding=3)
    return jnp.tanh(x)


# ----------------------------------------------------------------------------
# Deterministic synthetic parameters (PyTorch layouts; weight_norm at init
# reproduces the underlying weight so plain tensors are used).
# ----------------------------------------------------------------------------
def init_params(key, cfg):
    keys = iter(jax.random.split(key, 256))
    scale = 0.05

    def nrm(shape):
        return scale * jax.random.normal(next(keys), shape, jnp.float32)

    c = cfg['c']
    params = {'pre_w': nrm((c, 80, 7)), 'pre_b': nrm((c,)), 'blocks': []}
    for i in range(len(cfg['upsample_rates'])):
        ks = cfg['upsample_kernel_sizes'][i]
        blk = {'tconv_w': nrm((c, c // 2, ks)),          # ConvTranspose1d (Cin,Cout,K)
               'tconv_b': nrm((c // 2,)),
               'mrf': []}
        ch = c // 2
        for j, ksz in enumerate(cfg['mrf_kernel_sizes']):
            layers = []
            for d in cfg['mrf_dilations'][j]:
                layers.append({'w1': nrm((ch, ch, ksz)), 'b1': nrm((ch,)),
                               'w2': nrm((ch, ch, ksz)), 'b2': nrm((ch,))})
            blk['mrf'].append(layers)
        params['blocks'].append(blk)
        c //= 2
    params['post_w'] = nrm((1, c, 7))
    params['post_b'] = nrm((1,))
    return params


if __name__ == "__main__":
    key = jax.random.PRNGKey(0)
    kp, kx, kc, kr, kp2, kx2 = jax.random.split(key, 6)

    # --- standalone conv check: multi-tile grid + halo, both tap paths -------
    xa = jax.random.normal(kc, (1, 24, 16), jnp.float32)
    wa = 0.1 * jax.random.normal(jax.random.PRNGKey(1), (3, 16, 16), jnp.float32)
    ba = 0.1 * jax.random.normal(jax.random.PRNGKey(2), (1, 16), jnp.float32)
    ref_c = lax.conv_general_dilated(
        jnp.transpose(xa, (0, 2, 1)), jnp.transpose(wa, (2, 1, 0)),
        window_strides=(1,), padding=[(2, 2)], rhs_dilation=(2,),
        dimension_numbers=('NCH', 'OIH', 'NCH'))
    ref_c = jnp.transpose(ref_c, (0, 2, 1)) + ba
    for ft in (True, False):
        got = jax.block_until_ready(
            conv1d_pallas(xa, wa, ba, dilation=2, pad_left=2, pad_right=2,
                          fuse_taps=ft, tile_t=16))
        np.testing.assert_allclose(np.asarray(got), np.asarray(ref_c),
                                   rtol=1e-4, atol=1e-4)

    # --- standalone fused ResBlock-layer check (both tap paths, with accum) --
    xr = jax.random.normal(kr, (1, 40, 16), jnp.float32)
    kk = jax.random.split(jax.random.PRNGKey(3), 5)
    w1_raw = 0.1 * jax.random.normal(kk[0], (16, 16, 3), jnp.float32)   # (O,I,K)
    b1_raw = 0.1 * jax.random.normal(kk[1], (16,), jnp.float32)
    w2_raw = 0.1 * jax.random.normal(kk[2], (16, 16, 3), jnp.float32)
    b2_raw = 0.1 * jax.random.normal(kk[3], (16,), jnp.float32)
    acc_r = jax.random.normal(kk[4], (1, 40, 16), jnp.float32)
    x_nct = jnp.transpose(xr, (0, 2, 1))
    h_r = _leaky(_ref_conv1d(x_nct, w1_raw, b1_raw, dilation=2,
                             padding=get_padding(3, 2)), 0.1)
    h_r = _leaky(_ref_conv1d(h_r, w2_raw, b2_raw, dilation=1,
                             padding=get_padding(3, 1)), 0.1)
    rb_ref = jnp.transpose(x_nct + h_r, (0, 2, 1)) + acc_r
    w1_p = jnp.transpose(w1_raw, (2, 1, 0))
    w2_p = jnp.transpose(w2_raw, (2, 1, 0))
    for ft in (True, False):
        got = jax.block_until_ready(
            resblock_layer_pallas(xr, w1_p, b1_raw.reshape(1, -1),
                                  w2_p, b2_raw.reshape(1, -1),
                                  kernel_size=3, dilation=2, accum=acc_r,
                                  tile_t=16, fuse_taps=ft))
        np.testing.assert_allclose(np.asarray(got), np.asarray(rb_ref),
                                   rtol=1e-4, atol=1e-4)

    # --- full generator, f32 (tight numeric check vs lax reference) ---------
    cfg = dict(c=32,
               upsample_rates=[2, 2],
               upsample_kernel_sizes=[4, 4],
               mrf_kernel_sizes=[3, 5],
               mrf_dilations=[[1, 2], [1, 2]])
    raw = init_params(kp, cfg)
    # x: (batch=2, n_mels=80, frames=40) -- PyTorch NCL layout.
    x = jax.random.normal(kx, (2, 80, 40), jnp.float32)

    params32 = prepare_params(raw, cfg, jnp.float32)
    fwd32 = jax.jit(lambda inp: generator_forward(params32, inp, cfg, tile_t=16))
    out32 = jax.block_until_ready(fwd32(x))
    assert out32.shape == (2, 1, 40 * 2 * 2), out32.shape
    ref = ref_forward(raw, x, cfg)
    np.testing.assert_allclose(np.asarray(out32), np.asarray(ref),
                               rtol=1e-4, atol=1e-4)

    # --- full generator, bf16 activations/weights with f32 accumulation -----
    params16 = prepare_params(raw, cfg, jnp.bfloat16)
    fwd16 = jax.jit(lambda inp: generator_forward(params16, inp, cfg, tile_t=16))
    out16 = jax.block_until_ready(fwd16(x))
    assert out16.shape == (2, 1, 160), out16.shape
    assert bool(jnp.all(jnp.isfinite(out16.astype(jnp.float32))))

    # --- config exercising the non-divisible polyphase (tail-trim) path -----
    cfg2 = dict(c=16, upsample_rates=[2], upsample_kernel_sizes=[5],
                mrf_kernel_sizes=[3], mrf_dilations=[[1, 3]])
    raw2 = init_params(kp2, cfg2)
    x2 = jax.random.normal(kx2, (1, 80, 25), jnp.float32)
    params2 = prepare_params(raw2, cfg2, jnp.float32)
    fwd2 = jax.jit(lambda inp: generator_forward(params2, inp, cfg2, tile_t=32))
    out2 = jax.block_until_ready(fwd2(x2))
    assert out2.shape == (1, 1, (25 - 1) * 2 - 2 + 5), out2.shape
    ref2 = ref_forward(raw2, x2, cfg2)
    np.testing.assert_allclose(np.asarray(out2), np.asarray(ref2),
                               rtol=1e-4, atol=1e-4)

    print("KERNEL_OK")
</pallas_src>

<mosaic_0001>
module attributes {stable_mosaic.version = 11 : i64} {
  func.func @kernel(%arg0: i32, %arg1: i32, %arg2: memref<1x16x16xf32, #tpu.memory_space<vmem>>, %arg3: memref<1x8x16xf32, #tpu.memory_space<vmem>>, %arg4: memref<48x16xf32, #tpu.memory_space<vmem>>, %arg5: memref<1x16xf32, #tpu.memory_space<vmem>>, %arg6: memref<1x16x16xf32, #tpu.memory_space<vmem>>) attributes {dimension_semantics = [#tpu.dimension_semantics<parallel>, #tpu.dimension_semantics<parallel>], iteration_bounds = array<i64: 1, 2>, scalar_prefetch = 0 : i64, scratch_operands = 0 : i64, tpu.core_type = #tpu.core_type<tc>, window_params = [{transform_indices = @transform_0, window_bounds = array<i64: 1, 16, 16>}, {transform_indices = @transform_1, window_bounds = array<i64: 1, 8, 16>}, {pipeline_mode = #tpu.pipeline_mode<synchronous>, transform_indices = @transform_2, window_bounds = array<i64: 48, 16>}, {pipeline_mode = #tpu.pipeline_mode<synchronous>, transform_indices = @transform_3, window_bounds = array<i64: 1, 16>}, {transform_indices = @transform_4, window_bounds = array<i64: 1, 16, 16>}]} {
    %c0 = arith.constant 0 : index
    %c0_0 = arith.constant 0 : index
    %c0_1 = arith.constant 0 : index
    %0 = vector.load %arg2[%c0, %c0_0, %c0_1] : memref<1x16x16xf32, #tpu.memory_space<vmem>>, vector<1x16x16xf32>
    %1 = vector.shape_cast %0 : vector<1x16x16xf32> to vector<16x16xf32>
    %c0_2 = arith.constant 0 : index
    %c0_3 = arith.constant 0 : index
    %c0_4 = arith.constant 0 : index
    %2 = vector.load %arg3[%c0_2, %c0_3, %c0_4] : memref<1x8x16xf32, #tpu.memory_space<vmem>>, vector<1x8x16xf32>
    %3 = vector.shape_cast %2 : vector<1x8x16xf32> to vector<8x16xf32>
    %4 = tpu.concatenate %1, %3 in 0 : vector<16x16xf32>, vector<8x16xf32> -> vector<24x16xf32>
    %5 = vector.extract_strided_slice %4 {offsets = [0, 0], sizes = [16, 16], strides = [1, 1]} : vector<24x16xf32> to vector<16x16xf32>
    %6 = vector.extract_strided_slice %4 {offsets = [2, 0], sizes = [16, 16], strides = [1, 1]} : vector<24x16xf32> to vector<16x16xf32>
    %7 = vector.extract_strided_slice %4 {offsets = [4, 0], sizes = [16, 16], strides = [1, 1]} : vector<24x16xf32> to vector<16x16xf32>
    %8 = tpu.concatenate %5, %6, %7 in 1 : vector<16x16xf32>, vector<16x16xf32>, vector<16x16xf32> -> vector<16x48xf32>
    %c0_5 = arith.constant 0 : index
    %c0_6 = arith.constant 0 : index
    %9 = vector.load %arg4[%c0_5, %c0_6] : memref<48x16xf32, #tpu.memory_space<vmem>>, vector<48x16xf32>
    %cst = arith.constant dense<0.000000e+00> : vector<16x16xf32>
    %10 = tpu.matmul %8, %9, %cst {dimension_numbers = #tpu.dot_dimension_numbers<[1], [0], [0], [1], [0, 0, 1, 1], [], []>} : vector<16x48xf32>, vector<48x16xf32>, vector<16x16xf32> -> vector<16x16xf32>
    %c0_7 = arith.constant 0 : index
    %c0_8 = arith.constant 0 : index
    %11 = vector.load %arg5[%c0_7, %c0_8] : memref<1x16xf32, #tpu.memory_space<vmem>>, vector<1x16xf32>
    %12 = vector.broadcast %11 : vector<1x16xf32> to vector<16x16xf32>
    %13 = arith.addf %10, %12 : vector<16x16xf32>
    %c0_9 = arith.constant 0 : index
    %c0_10 = arith.constant 0 : index
    %c0_11 = arith.constant 0 : index
    %14 = vector.load %arg6[%c0_9, %c0_10, %c0_11] : memref<1x16x16xf32, #tpu.memory_space<vmem>>, vector<1x16x16xf32>
    %15 = vector.shape_cast %14 : vector<1x16x16xf32> to vector<16x16xf32>
    %16 = vector.shape_cast %13 : vector<16x16xf32> to vector<1x16x16xf32>
    tpu.vector_store %arg6[%c0_9, %c0_10, %c0_11], %16 {strides = array<i32>} : memref<1x16x16xf32, #tpu.memory_space<vmem>>, vector<1x16x16xf32>,
    return
  }
  func.func @transform_0(%arg0: i32, %arg1: i32) -> (i32, i32, i32) {
    %c0_i32 = arith.constant 0 : i32
    %c0_i32_0 = arith.constant 0 : i32
    return %arg0, %arg1, %c0_i32 : i32, i32, i32
  }
  func.func @transform_1(%arg0: i32, %arg1: i32) -> (i32, i32, i32) {
    %c1_i32 = arith.constant 1 : i32
    %0 = arith.addi %arg1, %c1_i32 : i32
    %c2_i32 = arith.constant 2 : i32
    %1 = arith.muli %0, %c2_i32 : i32
    %c0_i32 = arith.constant 0 : i32
    %c0_i32_0 = arith.constant 0 : i32
    return %arg0, %1, %c0_i32 : i32, i32, i32
  }
  func.func @transform_2(%arg0: i32, %arg1: i32) -> (i32, i32) {
    %c0_i32 = arith.constant 0 : i32
    %c0_i32_0 = arith.constant 0 : i32
    %c0_i32_1 = arith.constant 0 : i32
    return %c0_i32, %c0_i32_0 : i32, i32
  }
  func.func @transform_3(%arg0: i32, %arg1: i32) -> (i32, i32) {
    %c0_i32 = arith.constant 0 : i32
    %c0_i32_0 = arith.constant 0 : i32
    %c0_i32_1 = arith.constant 0 : i32
    return %c0_i32, %c0_i32_0 : i32, i32
  }
  func.func @transform_4(%arg0: i32, %arg1: i32) -> (i32, i32, i32) {
    %c0_i32 = arith.constant 0 : i32
    %c0_i32_0 = arith.constant 0 : i32
    return %arg0, %arg1, %c0_i32 : i32, i32, i32
  }
}

</mosaic_0001>

<bundles_post_ra>
// kernel: tpu_custom_call.1
= control target key start
LH: loop header
LB: loop body
LE: loop exit
PB: predicated region body
PF: predicated region fallthrough
CT: control target
= control target key end

     0   :  { %s592_s15 = smov 0   ;;  %s594_s16 = smov 0   ;;  %s664_s0 = inlined_call_operand.vmem [shape: f32[1,40,16], index: 0, kind: input, shape index: {}]   ;;  %s665_s1 = inlined_call_operand.vmem [shape: f32[1,40,16], index: 1, kind: input, shape index: {}]   ;;  %s666_s2 = inlined_call_operand.vmem [shape: f32[48,16], index: 2, kind: input, shape index: {}]   ;;  %s667_s3 = inlined_call_operand.vmem [shape: f32[1,16], index: 3, kind: input, shape index: {}]   ;;  %s668_s4 = inlined_call_operand.vmem [shape: f32[1,32,16], index: 4, kind: output, shape index: {}]  }
   0x1   :  { %s596_s17 = smov 0  }
   0x2 LB: > { %s23_s18 = sadd.s32 1, %s559_s16  ;;  %p491_p0 = scmp.ge.s32.totalorder %s563_s17, 1  ;;  %s563_s17 = sphi %s596_s17, %s14_s17   ;;  %s559_s16 = sphi %s594_s16, %s670_s16   ;;  %s555_s15 = sphi %s592_s15, %s669_s15  }
   0x3   : > { %p24_p1 = scmp.ge.s32.totalorder %s23_s18, 2  ;;  %p214_p2 = scmp.lt.s32.totalorder %s563_s17, 3 }
   0x5   : > { %s672_s18 = smov (%p24_p1, %s23_s18), 0  ;;  %p215_p3 = pnand %p491_p0, %p214_p2 }
   0x6   : > { %s610_s19 = sshll.u32 (!%p215_p3), %s555_s15, 1  ;;  %s565_s14 = smov (!%p215_p3), 16  }
   0x7   : > { %218 = sbr.rel (%p215_p3) target bundleno = 274 (0x112), region = 36  ;;  %p269_p4 = scmp.lt.s32.totalorder (!%p215_p3), %s610_s19, 4 }
   0x8   : > { %s507_s24 = sadd.s32 (!%p215_p3), 2, %s610_s19  ;;  %s566_s15 = smov (!%p215_p3), 32  }
   0x9   : > { %p284_p5 = scmp.lt.s32.totalorder (!%p215_p3), %s507_s24, 4  ;;  %p295_p6 = scmp.lt.s32.totalorder (!%p215_p3), %s610_s19, 3 }
   0xc   : > { %v343_v0 = vld [vmem:[%s666_s2 + $0x28] sm:$0xff]  ;;  %v342_v1 = vld [vmem:[%s666_s2 + $0x20] sm:$0xff]  ;;  %v341_v2 = vld [vmem:[%s666_s2 + $0x18] sm:$0xff]  ;;  %s270_s27 = scalar_select %p269_p4, %s610_s19, 4  ;;  %vm308_vm0 = vcmask 1045504   ;;  %vm320_vm1 = vcmask 1043456  }
   0xd   : > { %365 = vmatpush.msra.mxu0 %v343_v0  ;;  %508 = vmatpush.msra.mxu1 %v343_v0  ;;  %v340_v3 = vld [vmem:[%s666_s2 + $0x10] sm:$0xff]  ;;  %v339_v4 = vld [vmem:[%s666_s2 + $0x8] sm:$0xff]  ;;  %s674_s24 = smov (!%p284_p5, %s507_s24), 4  ;;  %v338_v18 = vld [vmem:[%s666_s2] sm:$0xff]  ;;  %vm332_vm2 = vcmask 130048   ;;  %vm335_vm3 = vcmask 261120  }
   0xe   : > { %s493_s30 = sshll.u32 %s270_s27, 3  ;;  %s495_s10 = sshll.u32 %s674_s24, 3  ;;  %vm348_vm4 = vcmask 392192   ;;  %v540_v27 = vld [vmem:[%s667_s3] ss:$0 sm:$0xff] }
   0xf   : > { %366 = vmatpush.msra.mxu0 %v342_v1  ;;  %509 = vmatpush.msra.mxu1 %v342_v1  ;;  %s274_s7 = scalar_lea.vmem %s664_s0, %s493_s30  ;;  %s289_s13 = scalar_lea.vmem %s665_s1, %s495_s10 }
  0x10   : > { %v302_v5 = vld [vmem:[%s274_s7] sm:$0xff]  ;;  %v303_v6 = vld [vmem:[%s274_s7 + $0x8] sm:$0xff]  ;;  %s676_s19 = smov (!%p295_p6, %s610_s19), 3 }
  0x11   : > { %367 = vmatpush.msra.mxu0 %v341_v2  ;;  %510 = vmatpush.msra.mxu1 %v341_v2  ;;  %v309_v7 = vrot.slane %v302_v5, 2  ;;  %v310_v8 = vrot.slane %v303_v6, 2  ;;  %v321_v9 = vrot.slane %v302_v5, 4  ;;  %v322_v10 = vrot.slane %v303_v6, 4  ;;  %v304_v13 = vld [vmem:[%s289_s13] sm:$0xff]  ;;  %s497_s22 = sshll.u32 %s676_s19, 3 }
  0x12   : > { %v312_v14 = vrot.slane %v304_v13, 2  ;;  %v324_v15 = vrot.slane %v304_v13, 4  ;;  %s300_s27 = scalar_lea.vmem %s668_s4, %s497_s22 }
  0x13   : > { %368 = vmatpush.msra.mxu0 %v340_v3  ;;  %511 = vmatpush.msra.mxu1 %v340_v3  ;;  %v311_v11 = vsel %vm308_vm0, %v309_v7, %v310_v8  ;;  %v323_v12 = vsel %vm320_vm1, %v321_v9, %v322_v10 }
  0x14   : > { %314 = vrot.lane.b32.xlu0 %v311_v11, %s565_s14  ;;  %326 = vrot.lane.b32.xlu1 %v323_v12, %s566_s15  ;;  %v313_v16 = vsel %vm308_vm0, %v310_v8, %v312_v14  ;;  %v325_v17 = vsel %vm320_vm1, %v322_v10, %v324_v15 }
  0x15   : > { %369 = vmatpush.msra.mxu0 %v339_v4  ;;  %512 = vmatpush.msra.mxu1 %v339_v4 }
  0x17   : > { %370 = vmatpush.msra.mxu0 %v338_v18  ;;  %513 = vmatpush.msra.mxu1 %v338_v18 }
  0x1c   : > { %316 = vrot.lane.b32.xlu0 %v313_v16, %s565_s14  ;;  %328 = vrot.lane.b32.xlu1 %v325_v17, %s566_s15 }
  0x86   : > { %v315_v19 = vpop.permute.xlu0 %314  ;;  %v327_v20 = vpop.permute.xlu1 %326 }
  0x87   : > { %v333_v21 = vsel %vm332_vm2, %v302_v5, %v315_v19 }
  0x88   : > { %v336_v22 = vsel %vm335_vm3, %v333_v21, %v327_v20 }
  0x89   : > { %498 = vmatmul.msk.f32.vlgmr.msra.gmra.mxu0 %vm348_vm4, %v336_v22 }
  0x8e   : > { %v317_v23 = vpop.permute.xlu0 %316  ;;  %v329_v24 = vpop.permute.xlu1 %328 }
  0x8f   : > { %v334_v25 = vsel %vm332_vm2, %v303_v6, %v317_v23 }
  0x90   : > { %v337_v26 = vsel %vm335_vm3, %v334_v25, %v329_v24 }
  0x91   : > { %499 = vmatmul.msk.f32.vlgmr.msra.gmra.mxu1 %vm348_vm4, %v337_v26 }
 0x106   : > { %v372_v28 = vpop.f32.mrf.mxu0 }
 0x107   : > { %v373_v29 = vadd.f32 %v540_v27, %v372_v28 }
 0x109   : > { %378 = vst.msk [vmem:[%s300_s27] sm:$0xff] %vm332_vm2, %v373_v29 }
 0x10e   : > { %v375_v30 = vpop.f32.mrf.mxu1 }
 0x10f   : > { %v376_v31 = vadd.f32 %v540_v27, %v375_v30 }
 0x111   : > { %379 = vst.msk [vmem:[%s300_s27 + $0x8] sm:$0xff] %vm332_vm2, %v376_v31 }
 0x112 PF: > { %s14_s17 = sadd.s32 1, %s563_s17   ;;  %s669_s15 = smov %s559_s16 }
 0x113   : > { %p11_p7 = scmp.ge.s32.totalorder %s14_s17, 4   ;;  %s670_s16 = smov %s672_s18 }
 0x115   :  { %13 = sbr.rel (!%p11_p7) target bundleno = 2 (0x2), region = 69 }

</bundles_post_ra>
